<compile_context>
chip_gen: v7x
topology: tpu7x:2x2x1
jax: 0.10.0
libtpu: 0.0.40
codegen_flags: <defaults>
</compile_context>

<pallas_src>
import numpy as np
import jax
import jax.numpy as jnp
from jax import lax
from jax.experimental import pallas as pl
from jax.experimental.pallas import tpu as pltpu

_EPS = 1e-5  # PyTorch BatchNorm default eps


# ------------------------------ fused kernel --------------------------------

def make_fused_kernel(conv_dims, B, n_extra_linear):
    """conv_dims: tuple of (H, W, Cin, Cout) per conv block (pre-pool dims)."""

    def kernel(*refs):
        x_ref = refs[0]
        pos = 1
        h = x_ref[...]                                   # (H0*B, W0*C0), rows=(h,b), lanes=(w,c)

        for (H, W, Ci, Co) in conv_dims:
            m_ref, bmap_ref, selh_ref, e_ref = refs[pos:pos + 4]
            pos += 4
            R = H * B

            # Conv2d 3x3 pad=1 with BatchNorm2d folded in:
            #  * per-channel BN scale lives in the K rows of m_ref,
            #  * BN shift (+ conv bias) lives in the border-corrected bias map,
            #  * vertical taps come from sublane rolls (+-B rows) masked at the
            #    image border (zero padding), horizontal taps + their padding are
            #    block-folded into m_ref.
            # All three dy taps are merged into ONE matmul via lane concat.
            row = lax.broadcasted_iota(jnp.int32, (R, 1), 0)
            up = jnp.where(row >= B, pltpu.roll(h, shift=B, axis=0), 0.0)       # row h-1
            dn = jnp.where(row < R - B, pltpu.roll(h, shift=R - B, axis=0), 0.0)  # row h+1
            taps = jnp.concatenate([up, h, dn], axis=1).astype(jnp.bfloat16)    # (R, 3*W*Ci)
            y = jnp.dot(taps, m_ref[...],
                        preferred_element_type=jnp.float32) + bmap_ref[...]     # (R, W*Co)

            # MaxPool2d(2): vertical pair-max via sublane roll, even-h row select
            # (tiny 0/1 matmul), then horizontal pair-max via XLU lane roll and a
            # single even-w lane-select matmul.
            v = jnp.maximum(y, pltpu.roll(y, shift=R - B, axis=0))
            p1 = jnp.dot(selh_ref[...], v.astype(jnp.bfloat16),
                         preferred_element_type=jnp.float32)                    # (Ho*B, W*Co)
            hm = jnp.maximum(p1, pltpu.roll(p1, shift=W * Co - Co, axis=1))
            pooled = jnp.dot(hm.astype(jnp.bfloat16), e_ref[...],
                             preferred_element_type=jnp.float32)                # (Ho*B, Wo*Co)
            h = jnp.maximum(pooled, 0.0)                 # ReLU (f32)

        # Flatten (PyTorch (C,H,W) order absorbed into w1 layout) + BatchNorm1d +
        # Dropout(eval=identity) + Linear + ReLU: one K = Ho*Wo*C matmul.
        w1_ref, b1_ref = refs[pos:pos + 2]
        pos += 2
        Ho_last = conv_dims[-1][0] // 2
        flat = jnp.concatenate([h[i * B:(i + 1) * B, :] for i in range(Ho_last)],
                               axis=1)                   # (B, Ho*Wo*C)
        act = jnp.maximum(
            jnp.dot(flat.astype(jnp.bfloat16), w1_ref[...],
                    preferred_element_type=jnp.float32) + b1_ref[...], 0.0)

        # Remaining [BatchNorm1d -> Dropout -> Linear -> ReLU] blocks (BN folded
        # into the weight/bias at prep time).
        for _ in range(n_extra_linear):
            w_ref, b_ref = refs[pos:pos + 2]
            pos += 2
            z = jnp.dot(act.astype(jnp.bfloat16), w_ref[...],
                        preferred_element_type=jnp.float32) + b_ref[...]
            act = jnp.maximum(z, 0.0)

        refs[pos][...] = act

    return kernel


# --------------------------- parameter preprocessing ------------------------

def _bn_fold(gamma, beta, mean, var):
    scale = gamma / jnp.sqrt(var + _EPS)
    shift = beta - mean * scale
    return scale, shift


def make_conv_inputs(Kw, bias, gamma, beta, mean, var, H, W, B):
    """Kw: (Co, Ci, 3, 3) PyTorch conv weight; returns the 4 kernel operands."""
    Co, Ci = int(Kw.shape[0]), int(Kw.shape[1])
    Ho, Wo = H // 2, W // 2
    scale_c, shift_c = _bn_fold(gamma, beta, mean, var)

    # Horizontal shift matrices: S_dx[w_in, w] = 1 iff w_in == w + dx (zero pad folded in).
    S = {}
    for dx in (-1, 0, 1):
        s = np.zeros((W, W), np.float32)
        for w in range(W):
            if 0 <= w + dx < W:
                s[w + dx, w] = 1.0
        S[dx] = jnp.asarray(s)

    # Stacked conv matrix (3*W*Ci, W*Co): rows ordered [dy=-1 ; dy=0 ; dy=+1],
    # BN per-channel scale folded into the K rows.
    blocks = []
    for dy in (-1, 0, 1):
        m = jnp.zeros((W * Ci, W * Co), jnp.float32)
        for dx in (-1, 0, 1):
            tap = scale_c[:, None] * jnp.transpose(Kw[:, :, dy + 1, dx + 1], (1, 0))  # (Ci, Co)
            m = m + jnp.kron(S[dx], tap)
        blocks.append(m)
    M = jnp.concatenate(blocks, axis=0).astype(jnp.bfloat16)

    # Bias map: conv bias + BN shift pushed through the conv with zero padding
    # (border taps drop out exactly), laid out rows=(h,b), lanes=(w,co).
    shift_img = jnp.broadcast_to(shift_c, (1, H, W, Ci)).astype(jnp.float32)
    wk = jnp.transpose(Kw, (2, 3, 1, 0))                 # HWIO
    bmap = lax.conv_general_dilated(
        shift_img, wk, window_strides=(1, 1), padding="SAME",
        dimension_numbers=("NHWC", "HWIO", "NHWC"),
        precision=lax.Precision.HIGHEST)[0] + bias       # (H, W, Co)
    bmap = jnp.repeat(bmap.reshape(H, W * Co), B, axis=0).astype(jnp.float32)  # (H*B, W*Co)

    # Even-h row selection: (Ho*B, H*B), rows ordered (h, b).
    selh = np.zeros((Ho * B, H * B), np.float32)
    for ho in range(Ho):
        for b in range(B):
            selh[ho * B + b, (2 * ho) * B + b] = 1.0

    # Even-w lane selection (applied after the lane-roll pair max): (W*Co, Wo*Co).
    E = np.zeros((W * Co, Wo * Co), np.float32)
    for wo in range(Wo):
        for c in range(Co):
            E[(2 * wo) * Co + c, wo * Co + c] = 1.0

    return [M, bmap, jnp.asarray(selh, jnp.bfloat16), jnp.asarray(E, jnp.bfloat16)]


def make_linear1_inputs(Wl, bl, gamma, beta, mean, var, Ho, Wo, C):
    """First Linear after Flatten.  Wl: (D1, C*Ho*Wo) torch layout.  BatchNorm1d is
    folded into the weight/bias; the PyTorch (C,H,W) flatten order is absorbed by
    permuting the weight's input dimension into the kernel's (h, w, c) lane order."""
    D1 = int(Wl.shape[0])
    sc, sh = _bn_fold(gamma, beta, mean, var)            # (C*Ho*Wo,)
    Wf = sc[:, None] * Wl.T                              # (C*Ho*Wo, D1), torch flatten order
    W1L = jnp.transpose(Wf.reshape(C, Ho, Wo, D1), (1, 2, 0, 3)).reshape(Ho * Wo * C, D1)
    b1 = (sh @ Wl.T + bl)[None, :]
    return [W1L.astype(jnp.bfloat16), b1.astype(jnp.float32)]


def prepare_params(raw, B, dimension):
    H, W = dimension
    conv_dims = []
    flat = []
    for (Kw, bias, gamma, beta, mean, var) in raw["conv"]:
        Co, Ci = int(Kw.shape[0]), int(Kw.shape[1])
        assert H % 2 == 0 and W % 2 == 0, "MaxPool2d(2) pooling needs even H, W"
        conv_dims.append((H, W, Ci, Co))
        flat += make_conv_inputs(Kw, bias, gamma, beta, mean, var, H, W, B)
        H, W = H // 2, W // 2
    C_last = conv_dims[-1][3]
    n_feat = H * W * C_last

    lin = raw["linear"]
    assert int(lin[0][0].shape[1]) == n_feat, (lin[0][0].shape, n_feat)
    flat += make_linear1_inputs(*lin[0], H, W, C_last)
    for (Wl, bl, gamma, beta, mean, var) in lin[1:]:
        sc, sh = _bn_fold(gamma, beta, mean, var)
        Wf = (sc[:, None] * Wl.T).astype(jnp.bfloat16)   # BN1d scale folded into weight
        bf = (sh @ Wl.T + bl)[None, :].astype(jnp.float32)
        flat += [Wf, bf]

    return {
        "flat": flat,
        "kernel": make_fused_kernel(tuple(conv_dims), B, len(lin) - 1),
        "d_out": int(lin[-1][0].shape[0]),
    }


# ------------------------------ forward wrapper ------------------------------

def fused_forward(x, prep):
    B, H, W = x.shape
    # Kernel activation layout: rows = (h, b) on sublanes, lanes = (w, c) (c0 = 1).
    x_l = jnp.transpose(x.astype(jnp.float32), (1, 0, 2)).reshape(H * B, W)
    inputs = [x_l] + list(prep["flat"])

    in_specs = []
    for a in inputs:
        in_specs.append(pl.BlockSpec(a.shape, lambda i, nd=a.ndim: (0,) * nd))
    d_out = prep["d_out"]

    return pl.pallas_call(
        prep["kernel"],
        out_shape=jax.ShapeDtypeStruct((B, d_out), jnp.float32),
        grid_spec=pltpu.PrefetchScalarGridSpec(
            num_scalar_prefetch=0,
            grid=(1,),
            in_specs=in_specs,
            out_specs=pl.BlockSpec((B, d_out), lambda i: (0, 0)),
        ),
        compiler_params=pltpu.CompilerParams(dimension_semantics=("arbitrary",)),
    )(*inputs)


# --------------------------- parameters / reference --------------------------

def init_params(key, conv_channels, linear_layers):
    raw = {"conv": [], "linear": []}
    for cin, cout in zip(conv_channels[:-1], conv_channels[1:]):
        key, k1, k2, k3, k4, k5, k6 = jax.random.split(key, 7)
        Kw = 0.1 * jax.random.normal(k1, (cout, cin, 3, 3), jnp.float32)
        bias = 0.1 * jax.random.normal(k2, (cout,), jnp.float32)
        gamma = 1.0 + 0.1 * jax.random.normal(k3, (cin,), jnp.float32)
        beta = 0.1 * jax.random.normal(k4, (cin,), jnp.float32)
        mean = 0.1 * jax.random.normal(k5, (cin,), jnp.float32)
        var = jax.random.uniform(k6, (cin,), jnp.float32, minval=0.5, maxval=1.5)
        raw["conv"].append((Kw, bias, gamma, beta, mean, var))
    for din, dout in zip(linear_layers[:-1], linear_layers[1:]):
        key, k1, k2, k3, k4, k5, k6 = jax.random.split(key, 7)
        Wl = 0.1 * jax.random.normal(k1, (dout, din), jnp.float32)
        bl = 0.1 * jax.random.normal(k2, (dout,), jnp.float32)
        gamma = 1.0 + 0.1 * jax.random.normal(k3, (din,), jnp.float32)
        beta = 0.1 * jax.random.normal(k4, (din,), jnp.float32)
        mean = 0.1 * jax.random.normal(k5, (din,), jnp.float32)
        var = jax.random.uniform(k6, (din,), jnp.float32, minval=0.5, maxval=1.5)
        raw["linear"].append((Wl, bl, gamma, beta, mean, var))
    return raw


def reference_forward(x, raw):
    """Plain-JAX replica of the PyTorch module (eval mode), on raw torch-layout params."""
    h = x[..., None].astype(jnp.float32)                 # NHWC
    for (Kw, bias, gamma, beta, mean, var) in raw["conv"]:
        scale = gamma / jnp.sqrt(var + _EPS)
        shift = beta - mean * scale
        hb = h * scale + shift
        wk = jnp.transpose(Kw, (2, 3, 1, 0))             # HWIO
        conv = lax.conv_general_dilated(
            hb, wk, window_strides=(1, 1), padding="SAME",
            dimension_numbers=("NHWC", "HWIO", "NHWC"),
            precision=lax.Precision.HIGHEST) + bias
        pooled = lax.reduce_window(conv, -jnp.inf, lax.max,
                                   (1, 2, 2, 1), (1, 2, 2, 1), "VALID")
        h = jnp.maximum(pooled, 0.0)
    B = h.shape[0]
    h = jnp.transpose(h, (0, 3, 1, 2)).reshape(B, -1)    # nn.Flatten on NCHW
    for (Wl, bl, gamma, beta, mean, var) in raw["linear"]:
        scale = gamma / jnp.sqrt(var + _EPS)
        shift = beta - mean * scale
        h = jnp.maximum((h * scale + shift) @ Wl.T + bl, 0.0)
    return h


# ----------------------------------- main ------------------------------------

if __name__ == "__main__":
    # Model(conv_channels=[1,4,8], linear_layers=[128,32,10], dropout=0.5,
    #       dimension=(16,16)): 16 -> 8 -> 4 spatial; 4*4*8 = 128 features.
    conv_channels = [1, 4, 8]
    linear_layers = [128, 32, 10]
    B, H, W = 2, 16, 16
    assert conv_channels[0] == 1  # module does X.unsqueeze(1)

    key = jax.random.PRNGKey(0)
    kx, kp = jax.random.split(key)
    x = jax.random.normal(kx, (B, H, W), jnp.float32)
    raw = init_params(kp, conv_channels, linear_layers)

    prep = prepare_params(raw, B, (H, W))
    out = jax.block_until_ready(fused_forward(x, prep))
    ref = jax.block_until_ready(reference_forward(x, raw))

    assert out.shape == (B, linear_layers[-1]), out.shape
    # Matmuls run with bf16 operands + f32 accumulation; reference is pure f32.
    np.testing.assert_allclose(np.asarray(out), np.asarray(ref), rtol=2e-2, atol=2e-2)
    print("KERNEL_OK")
</pallas_src>

<mosaic_0001>
module attributes {stable_mosaic.version = 11 : i64} {
  func.func @kernel(%arg0: i32, %arg1: memref<32x16xf32, #tpu.memory_space<vmem>>, %arg2: memref<48x64xbf16, #tpu.memory_space<vmem>>, %arg3: memref<32x64xf32, #tpu.memory_space<vmem>>, %arg4: memref<16x32xbf16, #tpu.memory_space<vmem>>, %arg5: memref<64x32xbf16, #tpu.memory_space<vmem>>, %arg6: memref<96x64xbf16, #tpu.memory_space<vmem>>, %arg7: memref<16x64xf32, #tpu.memory_space<vmem>>, %arg8: memref<8x16xbf16, #tpu.memory_space<vmem>>, %arg9: memref<64x32xbf16, #tpu.memory_space<vmem>>, %arg10: memref<128x32xbf16, #tpu.memory_space<vmem>>, %arg11: memref<1x32xf32, #tpu.memory_space<vmem>>, %arg12: memref<32x10xbf16, #tpu.memory_space<vmem>>, %arg13: memref<1x10xf32, #tpu.memory_space<vmem>>, %arg14: memref<2x10xf32, #tpu.memory_space<vmem>>) attributes {dimension_semantics = [#tpu.dimension_semantics<arbitrary>], iteration_bounds = array<i64: 1>, scalar_prefetch = 0 : i64, scratch_operands = 0 : i64, tpu.core_type = #tpu.core_type<tc>, window_params = [{pipeline_mode = #tpu.pipeline_mode<synchronous>, transform_indices = @transform_0, window_bounds = array<i64: 32, 16>}, {pipeline_mode = #tpu.pipeline_mode<synchronous>, transform_indices = @transform_1, window_bounds = array<i64: 48, 64>}, {pipeline_mode = #tpu.pipeline_mode<synchronous>, transform_indices = @transform_2, window_bounds = array<i64: 32, 64>}, {pipeline_mode = #tpu.pipeline_mode<synchronous>, transform_indices = @transform_3, window_bounds = array<i64: 16, 32>}, {pipeline_mode = #tpu.pipeline_mode<synchronous>, transform_indices = @transform_4, window_bounds = array<i64: 64, 32>}, {pipeline_mode = #tpu.pipeline_mode<synchronous>, transform_indices = @transform_5, window_bounds = array<i64: 96, 64>}, {pipeline_mode = #tpu.pipeline_mode<synchronous>, transform_indices = @transform_6, window_bounds = array<i64: 16, 64>}, {pipeline_mode = #tpu.pipeline_mode<synchronous>, transform_indices = @transform_7, window_bounds = array<i64: 8, 16>}, {pipeline_mode = #tpu.pipeline_mode<synchronous>, transform_indices = @transform_8, window_bounds = array<i64: 64, 32>}, {pipeline_mode = #tpu.pipeline_mode<synchronous>, transform_indices = @transform_9, window_bounds = array<i64: 128, 32>}, {pipeline_mode = #tpu.pipeline_mode<synchronous>, transform_indices = @transform_10, window_bounds = array<i64: 1, 32>}, {pipeline_mode = #tpu.pipeline_mode<synchronous>, transform_indices = @transform_11, window_bounds = array<i64: 32, 10>}, {pipeline_mode = #tpu.pipeline_mode<synchronous>, transform_indices = @transform_12, window_bounds = array<i64: 1, 10>}, {pipeline_mode = #tpu.pipeline_mode<synchronous>, transform_indices = @transform_13, window_bounds = array<i64: 2, 10>}]} {
    %c0 = arith.constant 0 : index
    %c0_0 = arith.constant 0 : index
    %0 = vector.load %arg1[%c0, %c0_0] : memref<32x16xf32, #tpu.memory_space<vmem>>, vector<32x16xf32>
    %1 = tpu.iota {dimensions = array<i32: 0>} : vector<32x1xi32>
    %c2_i32 = arith.constant 2 : i32
    %2 = vector.broadcast %c2_i32 : i32 to vector<32x1xi32>
    %3 = arith.cmpi sge, %1, %2 : vector<32x1xi32>
    %c2_i32_1 = arith.constant 2 : i32
    %4 = tpu.dynamic_rotate %0 by %c2_i32_1 dim 0 : vector<32x16xf32>, i32 -> vector<32x16xf32>
    %cst = arith.constant 0.000000e+00 : f32
    %5 = vector.shape_cast %3 : vector<32x1xi1> to vector<32x1xi1>
    %6 = vector.broadcast %5 : vector<32x1xi1> to vector<32x16xi1>
    %7 = vector.broadcast %cst : f32 to vector<32x16xf32>
    %8 = arith.select %6, %4, %7 : vector<32x16xi1>, vector<32x16xf32>
    %c30_i32 = arith.constant 30 : i32
    %9 = vector.broadcast %c30_i32 : i32 to vector<32x1xi32>
    %10 = arith.cmpi slt, %1, %9 : vector<32x1xi32>
    %c30_i32_2 = arith.constant 30 : i32
    %11 = tpu.dynamic_rotate %0 by %c30_i32_2 dim 0 : vector<32x16xf32>, i32 -> vector<32x16xf32>
    %cst_3 = arith.constant 0.000000e+00 : f32
    %12 = vector.shape_cast %10 : vector<32x1xi1> to vector<32x1xi1>
    %13 = vector.broadcast %12 : vector<32x1xi1> to vector<32x16xi1>
    %14 = vector.broadcast %cst_3 : f32 to vector<32x16xf32>
    %15 = arith.select %13, %11, %14 : vector<32x16xi1>, vector<32x16xf32>
    %16 = tpu.concatenate %8, %0, %15 in 1 : vector<32x16xf32>, vector<32x16xf32>, vector<32x16xf32> -> vector<32x48xf32>
    %17 = arith.truncf %16 : vector<32x48xf32> to vector<32x48xbf16>
    %c0_4 = arith.constant 0 : index
    %c0_5 = arith.constant 0 : index
    %18 = vector.load %arg2[%c0_4, %c0_5] : memref<48x64xbf16, #tpu.memory_space<vmem>>, vector<48x64xbf16>
    %cst_6 = arith.constant dense<0.000000e+00> : vector<32x64xf32>
    %19 = tpu.matmul %17, %18, %cst_6 {dimension_numbers = #tpu.dot_dimension_numbers<[1], [0], [0], [1], [0, 0, 1, 1], [], []>} : vector<32x48xbf16>, vector<48x64xbf16>, vector<32x64xf32> -> vector<32x64xf32>
    %c0_7 = arith.constant 0 : index
    %c0_8 = arith.constant 0 : index
    %20 = vector.load %arg3[%c0_7, %c0_8] : memref<32x64xf32, #tpu.memory_space<vmem>>, vector<32x64xf32>
    %21 = arith.addf %19, %20 : vector<32x64xf32>
    %c30_i32_9 = arith.constant 30 : i32
    %22 = tpu.dynamic_rotate %21 by %c30_i32_9 dim 0 : vector<32x64xf32>, i32 -> vector<32x64xf32>
    %23 = arith.maximumf %21, %22 : vector<32x64xf32>
    %c0_10 = arith.constant 0 : index
    %c0_11 = arith.constant 0 : index
    %24 = vector.load %arg4[%c0_10, %c0_11] : memref<16x32xbf16, #tpu.memory_space<vmem>>, vector<16x32xbf16>
    %25 = arith.truncf %23 : vector<32x64xf32> to vector<32x64xbf16>
    %cst_12 = arith.constant dense<0.000000e+00> : vector<16x64xf32>
    %26 = tpu.matmul %24, %25, %cst_12 {dimension_numbers = #tpu.dot_dimension_numbers<[1], [0], [0], [1], [0, 0, 1, 1], [], []>} : vector<16x32xbf16>, vector<32x64xbf16>, vector<16x64xf32> -> vector<16x64xf32>
    %c60_i32 = arith.constant 60 : i32
    %27 = tpu.dynamic_rotate %26 by %c60_i32 dim 1 : vector<16x64xf32>, i32 -> vector<16x64xf32>
    %28 = arith.maximumf %26, %27 : vector<16x64xf32>
    %29 = arith.truncf %28 : vector<16x64xf32> to vector<16x64xbf16>
    %c0_13 = arith.constant 0 : index
    %c0_14 = arith.constant 0 : index
    %30 = vector.load %arg5[%c0_13, %c0_14] : memref<64x32xbf16, #tpu.memory_space<vmem>>, vector<64x32xbf16>
    %cst_15 = arith.constant dense<0.000000e+00> : vector<16x32xf32>
    %31 = tpu.matmul %29, %30, %cst_15 {dimension_numbers = #tpu.dot_dimension_numbers<[1], [0], [0], [1], [0, 0, 1, 1], [], []>} : vector<16x64xbf16>, vector<64x32xbf16>, vector<16x32xf32> -> vector<16x32xf32>
    %cst_16 = arith.constant 0.000000e+00 : f32
    %32 = vector.broadcast %cst_16 : f32 to vector<16x32xf32>
    %33 = arith.maximumf %31, %32 : vector<16x32xf32>
    %34 = tpu.iota {dimensions = array<i32: 0>} : vector<16x1xi32>
    %c2_i32_17 = arith.constant 2 : i32
    %35 = vector.broadcast %c2_i32_17 : i32 to vector<16x1xi32>
    %36 = arith.cmpi sge, %34, %35 : vector<16x1xi32>
    %c2_i32_18 = arith.constant 2 : i32
    %37 = tpu.dynamic_rotate %33 by %c2_i32_18 dim 0 : vector<16x32xf32>, i32 -> vector<16x32xf32>
    %cst_19 = arith.constant 0.000000e+00 : f32
    %38 = vector.shape_cast %36 : vector<16x1xi1> to vector<16x1xi1>
    %39 = vector.broadcast %38 : vector<16x1xi1> to vector<16x32xi1>
    %40 = vector.broadcast %cst_19 : f32 to vector<16x32xf32>
    %41 = arith.select %39, %37, %40 : vector<16x32xi1>, vector<16x32xf32>
    %c14_i32 = arith.constant 14 : i32
    %42 = vector.broadcast %c14_i32 : i32 to vector<16x1xi32>
    %43 = arith.cmpi slt, %34, %42 : vector<16x1xi32>
    %c14_i32_20 = arith.constant 14 : i32
    %44 = tpu.dynamic_rotate %33 by %c14_i32_20 dim 0 : vector<16x32xf32>, i32 -> vector<16x32xf32>
    %cst_21 = arith.constant 0.000000e+00 : f32
    %45 = vector.shape_cast %43 : vector<16x1xi1> to vector<16x1xi1>
    %46 = vector.broadcast %45 : vector<16x1xi1> to vector<16x32xi1>
    %47 = vector.broadcast %cst_21 : f32 to vector<16x32xf32>
    %48 = arith.select %46, %44, %47 : vector<16x32xi1>, vector<16x32xf32>
    %49 = tpu.concatenate %41, %33, %48 in 1 : vector<16x32xf32>, vector<16x32xf32>, vector<16x32xf32> -> vector<16x96xf32>
    %50 = arith.truncf %49 : vector<16x96xf32> to vector<16x96xbf16>
    %c0_22 = arith.constant 0 : index
    %c0_23 = arith.constant 0 : index
    %51 = vector.load %arg6[%c0_22, %c0_23] : memref<96x64xbf16, #tpu.memory_space<vmem>>, vector<96x64xbf16>
    %cst_24 = arith.constant dense<0.000000e+00> : vector<16x64xf32>
    %52 = tpu.matmul %50, %51, %cst_24 {dimension_numbers = #tpu.dot_dimension_numbers<[1], [0], [0], [1], [0, 0, 1, 1], [], []>} : vector<16x96xbf16>, vector<96x64xbf16>, vector<16x64xf32> -> vector<16x64xf32>
    %c0_25 = arith.constant 0 : index
    %c0_26 = arith.constant 0 : index
    %53 = vector.load %arg7[%c0_25, %c0_26] : memref<16x64xf32, #tpu.memory_space<vmem>>, vector<16x64xf32>
    %54 = arith.addf %52, %53 : vector<16x64xf32>
    %c14_i32_27 = arith.constant 14 : i32
    %55 = tpu.dynamic_rotate %54 by %c14_i32_27 dim 0 : vector<16x64xf32>, i32 -> vector<16x64xf32>
    %56 = arith.maximumf %54, %55 : vector<16x64xf32>
    %c0_28 = arith.constant 0 : index
    %c0_29 = arith.constant 0 : index
    %57 = vector.load %arg8[%c0_28, %c0_29] : memref<8x16xbf16, #tpu.memory_space<vmem>>, vector<8x16xbf16>
    %58 = arith.truncf %56 : vector<16x64xf32> to vector<16x64xbf16>
    %cst_30 = arith.constant dense<0.000000e+00> : vector<8x64xf32>
    %59 = tpu.matmul %57, %58, %cst_30 {dimension_numbers = #tpu.dot_dimension_numbers<[1], [0], [0], [1], [0, 0, 1, 1], [], []>} : vector<8x16xbf16>, vector<16x64xbf16>, vector<8x64xf32> -> vector<8x64xf32>
    %c56_i32 = arith.constant 56 : i32
    %60 = tpu.dynamic_rotate %59 by %c56_i32 dim 1 : vector<8x64xf32>, i32 -> vector<8x64xf32>
    %61 = arith.maximumf %59, %60 : vector<8x64xf32>
    %62 = arith.truncf %61 : vector<8x64xf32> to vector<8x64xbf16>
    %c0_31 = arith.constant 0 : index
    %c0_32 = arith.constant 0 : index
    %63 = vector.load %arg9[%c0_31, %c0_32] : memref<64x32xbf16, #tpu.memory_space<vmem>>, vector<64x32xbf16>
    %cst_33 = arith.constant dense<0.000000e+00> : vector<8x32xf32>
    %64 = tpu.matmul %62, %63, %cst_33 {dimension_numbers = #tpu.dot_dimension_numbers<[1], [0], [0], [1], [0, 0, 1, 1], [], []>} : vector<8x64xbf16>, vector<64x32xbf16>, vector<8x32xf32> -> vector<8x32xf32>
    %cst_34 = arith.constant 0.000000e+00 : f32
    %65 = vector.broadcast %cst_34 : f32 to vector<8x32xf32>
    %66 = arith.maximumf %64, %65 : vector<8x32xf32>
    %67 = vector.extract_strided_slice %66 {offsets = [0, 0], sizes = [2, 32], strides = [1, 1]} : vector<8x32xf32> to vector<2x32xf32>
    %68 = vector.extract_strided_slice %66 {offsets = [2, 0], sizes = [2, 32], strides = [1, 1]} : vector<8x32xf32> to vector<2x32xf32>
    %69 = vector.extract_strided_slice %66 {offsets = [4, 0], sizes = [2, 32], strides = [1, 1]} : vector<8x32xf32> to vector<2x32xf32>
    %70 = vector.extract_strided_slice %66 {offsets = [6, 0], sizes = [2, 32], strides = [1, 1]} : vector<8x32xf32> to vector<2x32xf32>
    %71 = tpu.concatenate %67, %68, %69, %70 in 1 : vector<2x32xf32>, vector<2x32xf32>, vector<2x32xf32>, vector<2x32xf32> -> vector<2x128xf32>
    %72 = arith.truncf %71 : vector<2x128xf32> to vector<2x128xbf16>
    %c0_35 = arith.constant 0 : index
    %c0_36 = arith.constant 0 : index
    %73 = vector.load %arg10[%c0_35, %c0_36] : memref<128x32xbf16, #tpu.memory_space<vmem>>, vector<128x32xbf16>
    %cst_37 = arith.constant dense<0.000000e+00> : vector<2x32xf32>
    %74 = tpu.matmul %72, %73, %cst_37 {dimension_numbers = #tpu.dot_dimension_numbers<[1], [0], [0], [1], [0, 0, 1, 1], [], []>} : vector<2x128xbf16>, vector<128x32xbf16>, vector<2x32xf32> -> vector<2x32xf32>
    %c0_38 = arith.constant 0 : index
    %c0_39 = arith.constant 0 : index
    %75 = vector.load %arg11[%c0_38, %c0_39] : memref<1x32xf32, #tpu.memory_space<vmem>>, vector<1x32xf32>
    %76 = vector.broadcast %75 : vector<1x32xf32> to vector<2x32xf32>
    %77 = arith.addf %74, %76 : vector<2x32xf32>
    %cst_40 = arith.constant 0.000000e+00 : f32
    %78 = vector.broadcast %cst_40 : f32 to vector<2x32xf32>
    %79 = arith.maximumf %77, %78 : vector<2x32xf32>
    %80 = arith.truncf %79 : vector<2x32xf32> to vector<2x32xbf16>
    %c0_41 = arith.constant 0 : index
    %c0_42 = arith.constant 0 : index
    %81 = vector.load %arg12[%c0_41, %c0_42] : memref<32x10xbf16, #tpu.memory_space<vmem>>, vector<32x10xbf16>
    %cst_43 = arith.constant dense<0.000000e+00> : vector<2x10xf32>
    %82 = tpu.matmul %80, %81, %cst_43 {dimension_numbers = #tpu.dot_dimension_numbers<[1], [0], [0], [1], [0, 0, 1, 1], [], []>} : vector<2x32xbf16>, vector<32x10xbf16>, vector<2x10xf32> -> vector<2x10xf32>
    %c0_44 = arith.constant 0 : index
    %c0_45 = arith.constant 0 : index
    %83 = vector.load %arg13[%c0_44, %c0_45] : memref<1x10xf32, #tpu.memory_space<vmem>>, vector<1x10xf32>
    %84 = vector.broadcast %83 : vector<1x10xf32> to vector<2x10xf32>
    %85 = arith.addf %82, %84 : vector<2x10xf32>
    %cst_46 = arith.constant 0.000000e+00 : f32
    %86 = vector.broadcast %cst_46 : f32 to vector<2x10xf32>
    %87 = arith.maximumf %85, %86 : vector<2x10xf32>
    %c0_47 = arith.constant 0 : index
    %c0_48 = arith.constant 0 : index
    %88 = vector.load %arg14[%c0_47, %c0_48] : memref<2x10xf32, #tpu.memory_space<vmem>>, vector<2x10xf32>
    tpu.vector_store %arg14[%c0_47, %c0_48], %87 {strides = array<i32>} : memref<2x10xf32, #tpu.memory_space<vmem>>, vector<2x10xf32>,
    return
  }
  func.func @transform_0(%arg0: i32) -> (i32, i32) {
    %c0_i32 = arith.constant 0 : i32
    %c0_i32_0 = arith.constant 0 : i32
    %c0_i32_1 = arith.constant 0 : i32
    return %c0_i32, %c0_i32_0 : i32, i32
  }
  func.func @transform_1(%arg0: i32) -> (i32, i32) {
    %c0_i32 = arith.constant 0 : i32
    %c0_i32_0 = arith.constant 0 : i32
    %c0_i32_1 = arith.constant 0 : i32
    return %c0_i32, %c0_i32_0 : i32, i32
  }
  func.func @transform_2(%arg0: i32) -> (i32, i32) {
    %c0_i32 = arith.constant 0 : i32
    %c0_i32_0 = arith.constant 0 : i32
    %c0_i32_1 = arith.constant 0 : i32
    return %c0_i32, %c0_i32_0 : i32, i32
  }
  func.func @transform_3(%arg0: i32) -> (i32, i32) {
    %c0_i32 = arith.constant 0 : i32
    %c0_i32_0 = arith.constant 0 : i32
    %c0_i32_1 = arith.constant 0 : i32
    return %c0_i32, %c0_i32_0 : i32, i32
  }
  func.func @transform_4(%arg0: i32) -> (i32, i32) {
    %c0_i32 = arith.constant 0 : i32
    %c0_i32_0 = arith.constant 0 : i32
    %c0_i32_1 = arith.constant 0 : i32
    return %c0_i32, %c0_i32_0 : i32, i32
  }
  func.func @transform_5(%arg0: i32) -> (i32, i32) {
    %c0_i32 = arith.constant 0 : i32
    %c0_i32_0 = arith.constant 0 : i32
    %c0_i32_1 = arith.constant 0 : i32
    return %c0_i32, %c0_i32_0 : i32, i32
  }
  func.func @transform_6(%arg0: i32) -> (i32, i32) {
    %c0_i32 = arith.constant 0 : i32
    %c0_i32_0 = arith.constant 0 : i32
    %c0_i32_1 = arith.constant 0 : i32
    return %c0_i32, %c0_i32_0 : i32, i32
  }
  func.func @transform_7(%arg0: i32) -> (i32, i32) {
    %c0_i32 = arith.constant 0 : i32
    %c0_i32_0 = arith.constant 0 : i32
    %c0_i32_1 = arith.constant 0 : i32
    return %c0_i32, %c0_i32_0 : i32, i32
  }
  func.func @transform_8(%arg0: i32) -> (i32, i32) {
    %c0_i32 = arith.constant 0 : i32
    %c0_i32_0 = arith.constant 0 : i32
    %c0_i32_1 = arith.constant 0 : i32
    return %c0_i32, %c0_i32_0 : i32, i32
  }
  func.func @transform_9(%arg0: i32) -> (i32, i32) {
    %c0_i32 = arith.constant 0 : i32
    %c0_i32_0 = arith.constant 0 : i32
    %c0_i32_1 = arith.constant 0 : i32
    return %c0_i32, %c0_i32_0 : i32, i32
  }
  func.func @transform_10(%arg0: i32) -> (i32, i32) {
    %c0_i32 = arith.constant 0 : i32
    %c0_i32_0 = arith.constant 0 : i32
    %c0_i32_1 = arith.constant 0 : i32
    return %c0_i32, %c0_i32_0 : i32, i32
  }
  func.func @transform_11(%arg0: i32) -> (i32, i32) {
    %c0_i32 = arith.constant 0 : i32
    %c0_i32_0 = arith.constant 0 : i32
    %c0_i32_1 = arith.constant 0 : i32
    return %c0_i32, %c0_i32_0 : i32, i32
  }
  func.func @transform_12(%arg0: i32) -> (i32, i32) {
    %c0_i32 = arith.constant 0 : i32
    %c0_i32_0 = arith.constant 0 : i32
    %c0_i32_1 = arith.constant 0 : i32
    return %c0_i32, %c0_i32_0 : i32, i32
  }
  func.func @transform_13(%arg0: i32) -> (i32, i32) {
    %c0_i32 = arith.constant 0 : i32
    %c0_i32_0 = arith.constant 0 : i32
    %c0_i32_1 = arith.constant 0 : i32
    return %c0_i32, %c0_i32_0 : i32, i32
  }
}

</mosaic_0001>

<bundles_post_ra>
// kernel: tpu_custom_call.1
= control target key start
LH: loop header
LB: loop body
LE: loop exit
PB: predicated region body
PF: predicated region fallthrough
CT: control target
= control target key end

     0   :  { %v50_v3 = vlaneseq  ;;  %s1162_s16 = smov 16   ;;  %s1163_s22 = smov 32   ;;  %s1501_s0 = inlined_call_operand.vmem [shape: f32[32,16], index: 0, kind: input, shape index: {}]   ;;  %s1502_s1 = inlined_call_operand.vmem [shape: bf16[48,64], index: 1, kind: input, shape index: {}]   ;;  %s1503_s2 = inlined_call_operand.vmem [shape: f32[32,64], index: 2, kind: input, shape index: {}]   ;;  %s1504_s3 = inlined_call_operand.vmem [shape: bf16[16,32], index: 3, kind: input, shape index: {}]   ;;  %s1505_s4 = inlined_call_operand.vmem [shape: bf16[64,32], index: 4, kind: input, shape index: {}]   ;;  %s1506_s5 = inlined_call_operand.vmem [shape: bf16[96,64], index: 5, kind: input, shape index: {}]   ;;  %s1507_s6 = inlined_call_operand.vmem [shape: f32[16,64], index: 6, kind: input, shape index: {}]   ;;  %s1508_s7 = inlined_call_operand.vmem [shape: bf16[8,16], index: 7, kind: input, shape index: {}]   ;;  %s1509_s8 = inlined_call_operand.vmem [shape: bf16[64,32], index: 8, kind: input, shape index: {}]   ;;  %s1510_s9 = inlined_call_operand.vmem [shape: bf16[128,32], index: 9, kind: input, shape index: {}]   ;;  %s1511_s10 = inlined_call_operand.vmem [shape: f32[1,32], index: 10, kind: input, shape index: {}]   ;;  %s1512_s11 = inlined_call_operand.vmem [shape: bf16[32,10], index: 11, kind: input, shape index: {}]   ;;  %s1513_s12 = inlined_call_operand.vmem [shape: f32[1,10], index: 12, kind: input, shape index: {}]   ;;  %s1514_s13 = inlined_call_operand.hbm [shape: f32[2,10], index: 13, kind: output, shape index: {}]  }
   0x1   :  { %v46_v0 = vld [vmem:[%s1501_s0] sm:$0xff]  ;;  %v47_v1 = vld [vmem:[%s1501_s0 + $0x8] sm:$0xff]  ;;  %v48_v2 = vld [vmem:[%s1501_s0 + $0x10] sm:$0xff] }
   0x2   :  { %v60_v4 = vrot.slane %v47_v1, 6  ;;  %v85_v5 = vrot.slane %v47_v1, 2  ;;  %v1065_v6 = vpack.i.bf16 %v47_v1, %v46_v0  ;;  %v59_v7 = vrot.slane %v46_v0, 6  ;;  %v49_v8 = vld [vmem:[%s1501_s0 + $0x18] sm:$0xff]  ;;  %v1110_v16 = vld [vmem:[%s1502_s1] sm:$0xff]   ;;  %v1111_v17 = vld [vmem:[%s1502_s1 + $0x8] sm:$0xff]  }
   0x3   :  { %v84_v9 = vrot.slane %v46_v0, 2  ;;  %v1253_v10 = vshrl.u32 %v50_v3, 7  ;;  %v61_v11 = vrot.slane %v48_v2, 6  ;;  %v86_v12 = vrot.slane %v48_v2, 2  ;;  %964 = vmatprep.subr.bf16.mxu0 %v1110_v16  ;;  %v1112_v27 = vld [vmem:[%s1502_s1 + $0x10] sm:$0xff]  }
   0x4   :  { %1066 = vrot.lane.b32.xlu0 %v1065_v6, %s1162_s16  ;;  %v62_v13 = vrot.slane %v49_v8, 6  ;;  %v87_v14 = vrot.slane %v49_v8, 2  ;;  %v1070_v15 = vpack.i.bf16 %v49_v8, %v48_v2  ;;  %965 = vmatpush3.bf16.msra.mxu0 %v1110_v16 }
   0x5   :  { %vm88_vm0 = vcmp.lt.s32.totalorder %v1253_v10, 6  ;;  %v54_v18 = vadd.s32 24, %v1253_v10  ;;  %vm63_vm1 = vcmp.lt.s32.totalorder %v1253_v10, 2  ;;  %966 = vmatprep.subr.bf16.mxu0 %v1111_v17 }
   0x6   :  { %v90_v19 = vsel %vm88_vm0, %v85_v5, %v86_v12  ;;  %v91_v20 = vsel %vm88_vm0, %v84_v9, %v85_v5  ;;  %v89_v21 = vsel %vm88_vm0, %v86_v12, %v87_v14  ;;  %v92_v22 = vsel %vm88_vm0, %v87_v14, %v84_v9 }
   0x7   :  { %v1075_v23 = vpack.i.bf16 %v90_v19, %v91_v20  ;;  %vm83_vm2 = vcmp.lt.s32.totalorder %v54_v18, 30  ;;  %v64_v24 = vsel %vm63_vm1, %v61_v11, %v62_v13  ;;  %v65_v25 = vsel %vm63_vm1, %v60_v4, %v61_v11 }
   0x8   :  { %1071 = vrot.lane.b32.xlu0 %v1070_v15, %s1162_s16  ;;  %v104_v26 = vsel %vm83_vm2, %v92_v22, 0.0  ;;  %v66_v28 = vsel %vm63_vm1, %v59_v7, %v60_v4  ;;  %v67_v29 = vsel %vm63_vm1, %v62_v13, %v59_v7  ;;  %967 = vmatpush3.bf16.msra.mxu0 %v1111_v17 }
   0x9   :  { %1076 = vrot.lane.b32.xlu1 %v1075_v23, %s1163_s22  ;;  %v1080_v30 = vpack.i.bf16 %v104_v26, %v89_v21  ;;  %968 = vmatprep.subr.bf16.mxu0 %v1112_v27 }
   0xc   :  { %969 = vmatpush3.bf16.msra.mxu0 %v1112_v27 }
   0xd   :  { %1081 = vrot.lane.b32.xlu1 %v1080_v30, %s1163_s22 }
   0xe   :  { %18 = vsyncpa [#allocation3], 0  ;;  %vm55_vm3 = vcmp.ge.s32.totalorder %v1253_v10, 2  ;;  %vm137_vm4 = vcmask 130048   ;;  %vm142_vm5 = vcmask 261120   ;;  %vm177_vm6 = vcmask 392192  }
   0xf   :  { %v76_v34 = vsel %vm55_vm3, %v67_v29, 0.0  ;;  %v1164_v54 = vmov 0.0   ;;  %vm1165_vm7 = vmmov 0   ;;  %v157_v55 = vld [vmem:[%s1503_s2 + $0x10] sm:$0xff]  ;;  %v155_v56 = vld [vmem:[%s1503_s2] sm:$0xff]  ;;  %v158_v58 = vld [vmem:[%s1503_s2 + $0x18] sm:$0xff] }
  0x10   :  { %974 = vmatprep.subr.bf16.mxu1 %v1164_v54  ;;  %994 = vmatprep.subr.bf16.mxu0 %v1164_v54  ;;  %v156_v61 = vld [vmem:[%s1503_s2 + $0x8] sm:$0xff]  ;;  %v1113_v18 = vld [vmem:[%s1504_s3] sm:$0xff]   ;;  %s1166_s14 = smov 64   ;;  %vm298_vm8 = vcmask 1048064   ;;  %s1167_s21 = smov 124   ;;  %vm354_vm9 = vcmask 523264  }
  0x11   :  { %978 = vmatprep.mubr.msk.bf16.mxu1 %vm1165_vm7, %v1164_v54  ;;  %v1115_v26 = vld [vmem:[%s1505_s4 + $0x8] sm:$0xff]   ;;  %vm490_vm11 = vcmask 785408   ;;  %s1168_s24 = smov 120   ;;  %s1169_s20 = smov 96   ;;  %vm871_vm12 = vcmask 74752  }
  0x76   :  { %v1067_v31 = vpop.permute.xlu0 %1066 }
  0x77   :  { %v1069_v32 = vunpack.i.h.bf16 %v1067_v31  ;;  %v1068_v33 = vunpack.i.l.bf16 %v1067_v31 }
  0x79   :  { %v138_v39 = vsel %vm137_vm4, %v76_v34, %v1068_v33  ;;  %v139_v40 = vsel %vm137_vm4, %v66_v28, %v1069_v32  ;;  %v1116_v32 = vld [vmem:[%s1505_s4 + $0x10] sm:$0xff]   ;;  %v1117_v33 = vld [vmem:[%s1505_s4 + $0x18] sm:$0xff]  }
  0x7a   :  { %v1072_v35 = vpop.permute.xlu0 %1071 }
  0x7b   :  { %v1077_v36 = vpop.permute.xlu1 %1076  ;;  %v1074_v37 = vunpack.i.h.bf16 %v1072_v35  ;;  %v1073_v38 = vunpack.i.l.bf16 %v1072_v35 }
  0x7c   :  { %v1079_v41 = vunpack.i.h.bf16 %v1077_v36  ;;  %v1078_v42 = vunpack.i.l.bf16 %v1077_v36 }
  0x7d   :  { %v141_v45 = vsel %vm137_vm4, %v64_v24, %v1074_v37  ;;  %v140_v46 = vsel %vm137_vm4, %v65_v25, %v1073_v38  ;;  %v1114_v24 = vld [vmem:[%s1505_s4] sm:$0xff]  }
  0x7e   :  { %v143_v43 = vsel %vm142_vm5, %v138_v39, %v1078_v42  ;;  %v144_v44 = vsel %vm142_vm5, %v139_v40, %v1079_v41 }
  0x7f   :  { %v1082_v47 = vpop.permute.xlu1 %1081  ;;  %v147_v48 = vpack.c.bf16 %v144_v44, %v143_v43 }
  0x80   :  { %v1084_v49 = vunpack.i.h.bf16 %v1082_v47  ;;  %v1083_v50 = vunpack.i.l.bf16 %v1082_v47  ;;  %v1119_v47 = vld [vmem:[%s1506_s5 + $0x8] sm:$0xff]  }
  0x81   :  { %970 = vmatprep.mubr.msk.bf16.mxu0 %vm177_vm6, %v147_v48  ;;  %v1120_v48 = vld [vmem:[%s1506_s5 + $0x10] sm:$0xff]  }
  0x82   :  { %v146_v51 = vsel %vm142_vm5, %v141_v45, %v1084_v49  ;;  %v145_v52 = vsel %vm142_vm5, %v140_v46, %v1083_v50  ;;  %v1118_v46 = vld [vmem:[%s1506_s5] sm:$0xff]   ;;  %v1121_v49 = vld [vmem:[%s1506_s5 + $0x18] sm:$0xff]  }
  0x83   :  { %v148_v53 = vpack.c.bf16 %v146_v51, %v145_v52  ;;  %v1122_v50 = vld [vmem:[%s1506_s5 + $0x20] sm:$0xff]   ;;  %v1123_v51 = vld [vmem:[%s1506_s5 + $0x28] sm:$0xff]  }
  0x85   :  { %971 = vmatmul.mubr.msk.bf16.vlgmr.msra.gmra.mrb[0].mxu0 %vm177_vm6, %v148_v53  ;;  %v52_v53 = vadd.s32 8, %v1253_v10 }
  0x86   :  { %1006 = vmatprep.mubr.msk.bf16.mxu0 %vm1165_vm7, %v1164_v54  ;;  %995 = vmatpush3.bf16.msra.mxu0 %v1118_v46 }
  0x87   :  { %996 = vmatprep.subr.bf16.mxu0 %v1164_v54  ;;  %vm408_vm10 = vcmp.lt.s32.totalorder %v52_v53, 14  ;;  %v1131_v53 = vld [vmem:[%s1510_s9 + $0x18] sm:$0xff]  }
  0x8a   :  { %997 = vmatpush3.bf16.msra.mxu0 %v1119_v47 }
  0x8b   :  { %998 = vmatprep.subr.bf16.mxu0 %v1164_v54 }
  0x8e   :  { %999 = vmatpush3.bf16.msra.mxu0 %v1120_v48 }
  0x8f   :  { %1000 = vmatprep.subr.bf16.mxu0 %v1164_v54 }
  0x92   :  { %1001 = vmatpush3.bf16.msra.mxu0 %v1121_v49 }
  0x93   :  { %1002 = vmatprep.subr.bf16.mxu0 %v1164_v54 }
  0x96   :  { %1003 = vmatpush3.bf16.msra.mxu0 %v1122_v50  ;;  %v1128_v50 = vld [vmem:[%s1510_s9] sm:$0xff]  }
  0x97   :  { %1004 = vmatprep.subr.bf16.mxu0 %v1164_v54 }
  0x9a   :  { %1005 = vmatpush3.bf16.msra.mxu0 %v1123_v51  ;;  %v1129_v51 = vld [vmem:[%s1510_s9 + $0x8] sm:$0xff]  }
  0x9b   :  { %1028 = vmatprep.subr.bf16.mxu0 %v1164_v54 }
 0x158   :  { %v972_v57 = vpop.f32.mrb[0].mxu0 }
 0x159   :  { %v227_v59 = vadd.f32 %v972_v57, %v157_v55  ;;  %v218_v60 = vpop.f32.mrb[1].mxu0 }
 0x15a   :  { %v219_v62 = vadd.f32 %v218_v60, %v155_v56  ;;  %v973_v63 = vpop.f32.mrb[2].mxu0 }
 0x15b   :  { %v230_v0 = vadd.f32 %v973_v63, %v158_v58  ;;  %v221_v1 = vpop.f32.mrb[3].mxu0  ;;  %v235_v4 = vrot.slane %v227_v59, 2 }
 0x15c   :  { %v233_v2 = vrot.slane %v219_v62, 2  ;;  %v222_v3 = vadd.f32 %v221_v1, %v156_v61 }
 0x15d   :  { %v236_v5 = vrot.slane %v230_v0, 2 }
 0x15e   :  { %v234_v6 = vrot.slane %v222_v3, 2 }
 0x15f   :  { %v240_v7 = vsel %vm88_vm0, %v236_v5, %v233_v2  ;;  %v237_v8 = vsel %vm88_vm0, %v235_v4, %v236_v5 }
 0x160   :  { %v244_v9 = vmax.f32 %v230_v0, %v240_v7  ;;  %v238_v11 = vsel %vm88_vm0, %v234_v6, %v235_v4  ;;  %v239_v12 = vsel %vm88_vm0, %v233_v2, %v234_v6  ;;  %v243_v13 = vmax.f32 %v227_v59, %v237_v8 }
 0x161   :  { %v242_v14 = vmax.f32 %v222_v3, %v238_v11  ;;  %v241_v15 = vmax.f32 %v219_v62, %v239_v12 }
 0x162   :  { %v248_v16 = vpack.c.bf16 %v244_v9, %v243_v13 }
 0x163   :  { %v247_v17 = vpack.c.bf16 %v242_v14, %v241_v15 }
 0x165   :  { %975 = vmatpush3.bf16.msra.mxu1 %v247_v17 }
 0x166   :  { %976 = vmatprep.subr.bf16.mxu1 %v1164_v54 }
 0x169   :  { %977 = vmatpush3.bf16.msra.mxu1 %v248_v16 }
 0x16a   :  { %982 = vmatprep.subr.bf16.mxu1 %v1164_v54 }
 0x16c   :  { %979 = vmatmul.mubr.msk.bf16.vlgmr.msra.gmra.mrb[0].mxu1 %vm142_vm5, %v1113_v18 }
 0x16d   :  { %990 = vmatprep.mubr.msk.bf16.mxu1 %vm1165_vm7, %v1164_v54  ;;  %983 = vmatpush3.bf16.msra.mxu1 %v1114_v24 }
 0x16e   :  { %984 = vmatprep.subr.bf16.mxu1 %v1164_v54 }
 0x171   :  { %985 = vmatpush3.bf16.msra.mxu1 %v1115_v26 }
 0x172   :  { %986 = vmatprep.subr.bf16.mxu1 %v1164_v54 }
 0x175   :  { %987 = vmatpush3.bf16.msra.mxu1 %v1116_v32 }
 0x176   :  { %988 = vmatprep.subr.bf16.mxu1 %v1164_v54 }
 0x179   :  { %989 = vmatpush3.bf16.msra.mxu1 %v1117_v33 }
 0x17a   :  { %1010 = vmatprep.subr.bf16.mxu1 %v1164_v54 }
 0x23f   :  { %v291_v19 = vpop.f32.mrb[0].mxu1 }
 0x240   :  { %v980_v20 = vpop.f32.mrb[1].mxu1 }
 0x241   :  { %v294_v21 = vpop.f32.mrb[2].mxu1  ;;  %v452_v20 = vld [vmem:[%s1507_s6] sm:$0xff] }
 0x242   :  { %v981_v22 = vpop.f32.mrb[3].mxu1  ;;  %v1085_v23 = vpack.i.bf16 %v294_v21, %v291_v19 }
 0x243   :  { %v453_v22 = vld [vmem:[%s1507_s6 + $0x8] sm:$0xff] }
 0x244   :  { %1086 = vrot.lane.b32.xlu0 %v1085_v23, %s1166_s14 }
 0x2b6   :  { %v1087_v25 = vpop.permute.xlu0 %1086 }
 0x2b7   :  { %v1089_v27 = vunpack.i.h.bf16 %v1087_v25  ;;  %v1088_v28 = vunpack.i.l.bf16 %v1087_v25 }
 0x2b9   :  { %v301_v29 = vsel %vm298_vm8, %v1088_v28, %v291_v19  ;;  %v304_v30 = vsel %vm298_vm8, %v1089_v27, %v294_v21 }
 0x2ba   :  { %v1090_v31 = vpack.i.bf16 %v304_v30, %v301_v29 }
 0x2bc   :  { %1091 = vrot.lane.b32.xlu1 %v1090_v31, %s1166_s14 }
 0x32e   :  { %v1092_v34 = vpop.permute.xlu1 %1091 }
 0x32f   :  { %v1094_v35 = vunpack.i.h.bf16 %v1092_v34  ;;  %v1093_v36 = vunpack.i.l.bf16 %v1092_v34 }
 0x331   :  { %v309_v37 = vsel %vm298_vm8, %v1093_v36, %v291_v19  ;;  %v310_v38 = vsel %vm298_vm8, %v1094_v35, %v294_v21  ;;  %v541_v35 = vld [vmem:[%s1508_s7] sm:$0xf] }
 0x332   :  { %v1095_v39 = vpack.i.bf16 %v310_v38, %v309_v37 }
 0x334   :  { %1096 = vrot.lane.b32.xlu0 %v1095_v39, %s1167_s21  ;;  %v1124_v39 = vld [vmem:[%s1509_s8] sm:$0xff]  }
 0x3a6   :  { %v1097_v40 = vpop.permute.xlu0 %1096 }
 0x3a7   :  { %v1099_v41 = vunpack.i.h.bf16 %v1097_v40  ;;  %v1098_v42 = vunpack.i.l.bf16 %v1097_v40  ;;  %v1125_v40 = vld [vmem:[%s1509_s8 + $0x8] sm:$0xff]  }
 0x3a9   :  { %v320_v43 = vmax.f32 %v294_v21, %v1099_v41  ;;  %v319_v44 = vmax.f32 %v291_v19, %v1098_v42  ;;  %v1126_v41 = vld [vmem:[%s1509_s8 + $0x10] sm:$0xff]  }
 0x3ab   :  { %v321_v45 = vpack.c.bf16 %v320_v43, %v319_v44  ;;  %v1127_v44 = vld [vmem:[%s1509_s8 + $0x18] sm:$0xff]  }
 0x3ad   :  { %991 = vmatmul.mubr.msk.bf16.vlgmr.msra.gmra.mrb[4].mxu1 %vm354_vm9, %v321_v45 }
 0x3ae   :  { %1012 = vmatprep.mubr.msk.bf16.mxu1 %vm1165_vm7, %v1164_v54 }
 0x480   :  { %v392_v52 = vpop.f32.mrb[4].mxu1 }
 0x481   :  { %v399_v55 = vmax.f32 %v392_v52, 0.0  ;;  %v992_v56 = vpop.f32.mrb[5].mxu1  ;;  %v1130_v52 = vld [vmem:[%s1510_s9 + $0x10] sm:$0xff]  }
 0x482   :  { %v395_v57 = vpop.f32.mrb[6].mxu1  ;;  %v1133_v56 = vld [vmem:[%s1510_s9 + $0x28] sm:$0xff]  }
 0x483   :  { %v400_v58 = vmax.f32 %v395_v57, 0.0  ;;  %v993_v59 = vpop.f32.mrb[7].mxu1  ;;  %v401_v60 = vrot.slane %v399_v55, 6  ;;  %v409_v61 = vrot.slane %v399_v55, 2  ;;  %v1134_v57 = vld [vmem:[%s1510_s9 + $0x30] sm:$0xff]  }
 0x485   :  { %v402_v62 = vrot.slane %v400_v58, 6  ;;  %v410_v63 = vrot.slane %v400_v58, 2  ;;  %v1100_v0 = vpack.i.bf16 %v400_v58, %v399_v55  ;;  %v1132_v55 = vld [vmem:[%s1510_s9 + $0x20] sm:$0xff]   ;;  %v1135_v58 = vld [vmem:[%s1510_s9 + $0x38] sm:$0xff]  }
 0x487   :  { %1101 = vrot.lane.b32.xlu1 %v1100_v0, %s1163_s22  ;;  %v411_v1 = vsel %vm88_vm0, %v409_v61, %v410_v63  ;;  %v412_v2 = vsel %vm88_vm0, %v410_v63, %v409_v61  ;;  %v403_v3 = vsel %vm63_vm1, %v401_v60, %v402_v62  ;;  %v404_v4 = vsel %vm63_vm1, %v402_v62, %v401_v60 }
 0x488   :  { %v418_v5 = vsel %vm408_vm10, %v412_v2, 0.0  ;;  %v405_v12 = vsel %vm55_vm3, %v404_v4, 0.0 }
 0x489   :  { %v1105_v6 = vpack.i.bf16 %v418_v5, %v411_v1 }
 0x48b   :  { %1106 = vrot.lane.b32.xlu0 %v1105_v6, %s1166_s14 }
 0x4f9   :  { %v1102_v7 = vpop.permute.xlu1 %1101 }
 0x4fa   :  { %v1104_v8 = vunpack.i.h.bf16 %v1102_v7  ;;  %v1103_v9 = vunpack.i.l.bf16 %v1102_v7 }
 0x4fc   :  { %v435_v15 = vsel %vm142_vm5, %v405_v12, %v1103_v9  ;;  %v436_v16 = vsel %vm142_vm5, %v403_v3, %v1104_v8  ;;  %v1137_v12 = vld [vmem:[%s1512_s11 + $0x8] sm:$0xff]  }
 0x4fd   :  { %v1107_v11 = vpop.permute.xlu0 %1106 }
 0x4fe   :  { %v1109_v13 = vunpack.i.h.bf16 %v1107_v11  ;;  %v1108_v14 = vunpack.i.l.bf16 %v1107_v11  ;;  %v1136_v11 = vld [vmem:[%s1512_s11] sm:$0xff]   ;;  %s1170_s11 = smov [#allocation2]  }
 0x4ff   :  { %s879_s23 = sshll.u32 %s1170_s11, 4  ;;  %s880_s23 = int_to_ptr.vmem [resolvable:$true] %s879_s23 }
 0x500   :  { %v437_v17 = vsel %vm354_vm9, %v435_v15, %v1108_v14  ;;  %v438_v18 = vsel %vm354_vm9, %v436_v16, %v1109_v13  ;;  %v912_v13 = vld [vmem:[%s1511_s10] ss:$0 sm:$0xff]  ;;  %s1138_s10 = scalar_lea.vmem %s880_s23, 32  ;;  %p1143_p1 = scmp.lt.s32.totalorder %s880_s23, %s880_s23 }
 0x501   :  { %v439_v19 = vpack.c.bf16 %v438_v18, %v437_v17  ;;  %p1139_p0 = scmp.ne.s32.totalorder %s880_s23, %s1138_s10  ;;  %p1144_p2 = scmp.lt.s32.totalorder %s1138_s10, %s1138_s10 }
 0x503   :  { %1007 = vmatmul.mubr.msk.bf16.vlgmr.msra.gmra.mrb[4].mxu0 %vm490_vm11, %v439_v19  ;;  %p1145_p3 = por %p1144_p2, %p1143_p1 }
 0x504   :  { %1044 = vmatprep.mubr.msk.bf16.mxu0 %vm1165_vm7, %v1164_v54  ;;  %1029 = vmatpush3.bf16.msra.mxu0 %v1128_v50 }
 0x505   :  { %1030 = vmatprep.subr.bf16.mxu0 %v1164_v54  ;;  %p1146_p4 = pnand %p1145_p3, %p1139_p0 }
 0x508   :  { %1031 = vmatpush3.bf16.msra.mxu0 %v1129_v51 }
 0x509   :  { %1032 = vmatprep.subr.bf16.mxu0 %v1164_v54 }
 0x50c   :  { %1033 = vmatpush3.bf16.msra.mxu0 %v1130_v52 }
 0x50d   :  { %1034 = vmatprep.subr.bf16.mxu0 %v1164_v54 }
 0x510   :  { %1035 = vmatpush3.bf16.msra.mxu0 %v1131_v53 }
 0x511   :  { %1036 = vmatprep.subr.bf16.mxu0 %v1164_v54 }
 0x514   :  { %1037 = vmatpush3.bf16.msra.mxu0 %v1132_v55 }
 0x515   :  { %1038 = vmatprep.subr.bf16.mxu0 %v1164_v54 }
 0x518   :  { %1039 = vmatpush3.bf16.msra.mxu0 %v1133_v56 }
 0x519   :  { %1040 = vmatprep.subr.bf16.mxu0 %v1164_v54 }
 0x51c   :  { %1041 = vmatpush3.bf16.msra.mxu0 %v1134_v57 }
 0x51d   :  { %1042 = vmatprep.subr.bf16.mxu0 %v1164_v54 }
 0x520   :  { %1043 = vmatpush3.bf16.msra.mxu0 %v1135_v58 }
 0x5d6   :  { %v528_v21 = vpop.f32.mrb[4].mxu0 }
 0x5d7   :  { %v529_v23 = vadd.f32 %v528_v21, %v452_v20  ;;  %v1008_v24 = vpop.f32.mrb[5].mxu0 }
 0x5d8   :  { %v531_v25 = vpop.f32.mrb[6].mxu0 }
 0x5d9   :  { %v532_v26 = vadd.f32 %v531_v25, %v453_v22  ;;  %v1009_v27 = vpop.f32.mrb[7].mxu0  ;;  %v535_v28 = vrot.slane %v529_v23, 2 }
 0x5db   :  { %v536_v29 = vrot.slane %v532_v26, 2 }
 0x5dd   :  { %v537_v30 = vsel %vm88_vm0, %v535_v28, %v536_v29  ;;  %v538_v31 = vsel %vm88_vm0, %v536_v29, %v535_v28 }
 0x5de   :  { %v539_v32 = vmax.f32 %v529_v23, %v537_v30  ;;  %v540_v33 = vmax.f32 %v532_v26, %v538_v31 }
 0x5e0   :  { %v542_v34 = vpack.c.bf16 %v540_v33, %v539_v32 }
 0x5e2   :  { %1011 = vmatpush3.bf16.msra.mxu1 %v542_v34 }
 0x5e3   :  { %1016 = vmatprep.subr.bf16.mxu1 %v1164_v54 }
 0x5e5   :  { %1013 = vmatmul.mubr.msk.bf16.vlgmr.msra.gmra.mrb[8].mxu1 %vm137_vm4, %v541_v35 }
 0x5e6   :  { %1024 = vmatprep.mubr.msk.bf16.mxu1 %vm1165_vm7, %v1164_v54  ;;  %1017 = vmatpush3.bf16.msra.mxu1 %v1124_v39 }
 0x5e7   :  { %1018 = vmatprep.subr.bf16.mxu1 %v1164_v54 }
 0x5ea   :  { %1019 = vmatpush3.bf16.msra.mxu1 %v1125_v40 }
 0x5eb   :  { %1020 = vmatprep.subr.bf16.mxu1 %v1164_v54 }
 0x5ee   :  { %1021 = vmatpush3.bf16.msra.mxu1 %v1126_v41 }
 0x5ef   :  { %1022 = vmatprep.subr.bf16.mxu1 %v1164_v54 }
 0x5f2   :  { %1023 = vmatpush3.bf16.msra.mxu1 %v1127_v44 }
 0x5f3   :  { %1048 = vmatprep.subr.bf16.mxu1 %v1164_v54 }
 0x6b8   :  { %v580_v36 = vpop.f32.mrb[8].mxu1 }
 0x6b9   :  { %586 = vrot.lane.b32.xlu1 %v580_v36, %s1166_s14  ;;  %v1014_v10 = vpop.f32.mrb[9].mxu1 }
 0x6ba   :  { %v583_v37 = vpop.f32.mrb[10].mxu1 }
 0x6bb   :  { %v1015_v38 = vpop.f32.mrb[11].mxu1 }
 0x72b   :  { %v587_v42 = vpop.permute.xlu1 %586 }
 0x72c   :  { %v588_v43 = vsel %vm298_vm8, %v587_v42, %v580_v36 }
 0x72d   :  { %589 = vrot.lane.b32.xlu0 %v588_v43, %s1166_s14 }
 0x79f   :  { %v590_v45 = vpop.permute.xlu0 %589 }
 0x7a0   :  { %v591_v46 = vsel %vm298_vm8, %v590_v45, %v580_v36 }
 0x7a1   :  { %593 = vrot.lane.b32.xlu1 %v591_v46, %s1168_s24 }
 0x813   :  { %v594_v47 = vpop.permute.xlu1 %593 }
 0x814   :  { %v596_v48 = vmax.f32 %v580_v36, %v594_v47 }
 0x816   :  { %v597_v49 = vpack.c.bf16 %v596_v48, %v596_v48 }
 0x818   :  { %1025 = vmatmul.mubr.msk.bf16.vlgmr.msra.gmra.mrb[12].mxu1 %vm354_vm9, %v597_v49 }
 0x819   :  { %1052 = vmatprep.mubr.msk.bf16.mxu1 %vm1165_vm7, %v1164_v54  ;;  %1049 = vmatpush3.bf16.msra.mxu1 %v1136_v11 }
 0x81a   :  { %1050 = vmatprep.subr.bf16.mxu1 %v1164_v54  ;;  %v921_v54 = vld [vmem:[%s1513_s12] ss:$0 sm:$0xff] }
 0x81d   :  { %1051 = vmatpush3.bf16.msra.mxu1 %v1137_v12 }
 0x8eb   :  { %v667_v59 = vpop.f32.mrb[12].mxu1 }
 0x8ec   :  { %v673_v60 = vmax.f32 %v667_v59, 0.0  ;;  %v1026_v61 = vpop.f32.mrb[13].mxu1 }
 0x8ed   :  { %v670_v62 = vpop.f32.mrb[14].mxu1 }
 0x8ee   :  { %v1027_v63 = vpop.f32.mrb[15].mxu1  ;;  %v679_v0 = vrot.slane %v673_v60, 4  ;;  %v675_v1 = vrot.slane %v673_v60, 2  ;;  %v683_v2 = vrot.slane %v673_v60, 6 }
 0x8f0   :  { %680 = vrot.lane.b32.xlu1 %v679_v0, %s1166_s14  ;;  %676 = vrot.lane.b32.xlu0 %v675_v1, %s1163_s22 }
 0x8f4   :  { %684 = vrot.lane.b32.xlu0 %v683_v2, %s1169_s20 }
 0x962   :  { %v677_v3 = vpop.permute.xlu0 %676  ;;  %v681_v4 = vpop.permute.xlu1 %680 }
 0x963   :  { %v687_v5 = vsel %vm142_vm5, %v673_v60, %v677_v3 }
 0x964   :  { %v688_v6 = vsel %vm354_vm9, %v687_v5, %v681_v4 }
 0x966   :  { %v685_v7 = vpop.permute.xlu0 %684 }
 0x967   :  { %v689_v8 = vsel %vm490_vm11, %v688_v6, %v685_v7 }
 0x968   :  { %v690_v9 = vpack.c.bf16 %v689_v8, %v689_v8 }
 0x96a   :  { %1045 = vmatmul.mubr.bf16.vlgmr.msra.gmra.mrb[8].mxu0 %v690_v9 }
 0xa3d   :  { %v796_v14 = vpop.f32.mrb[8].mxu0 }
 0xa3e   :  { %v797_v15 = vadd.f32 %v912_v13, %v796_v14  ;;  %v1046_v16 = vpop.f32.mrb[9].mxu0 }
 0xa3f   :  { %v799_v17 = vpop.f32.mrb[10].mxu0 }
 0xa40   :  { %v802_v18 = vmax.f32 %v797_v15, 0.0  ;;  %v1047_v19 = vpop.f32.mrb[11].mxu0 }
 0xa42   :  { %v803_v20 = vpack.c.bf16 %v802_v18, %v802_v18 }
 0xa44   :  { %1053 = vmatmul.mubr.msk.bf16.vlgmr.msra.gmra.mrb[16].mxu1 %vm142_vm5, %v803_v20 }
 0xb17   :  { %v864_v21 = vpop.f32.mrb[16].mxu1 }
 0xb18   :  { %v865_v22 = vadd.f32 %v921_v54, %v864_v21  ;;  %v1054_v23 = vpop.f32.mrb[17].mxu1 }
 0xb19   :  { %v867_v24 = vpop.f32.mrb[18].mxu1 }
 0xb1a   :  { %v870_v25 = vmax.f32 %v865_v22, 0.0  ;;  %v1055_v26 = vpop.f32.mrb[19].mxu1 }
 0xb1c   :  { %872 = vst.msk [vmem:[#allocation2] sm:$0x3] %vm871_vm12, %v870_v25 }
 0xb1d   :  { %1149 = shalt.err (!%p1146_p4)
}
 0xb1e   :  { %s1150_s25 = scalar_lea.hbm %s1514_s13, 32 }
 0xb1f   :  { %p1151_p5 = scmp.ne.s32.totalorder %s1514_s13, %s1150_s25  ;;  %p1154_p6 = scmp.lt.u32.totalorder %s1150_s25, %s1514_s13 }
 0xb21   :  { %p1156_p7 = pnand %p1154_p6, %p1151_p5 }
 0xb23   :  { %1159 = shalt.err (!%p1156_p7)
}
 0xb24   :  { %882 = dma.vmem_to_hbm [thread:$0]  %s880_s23, 32, %s1514_s13, [#allocation3]  }
 0xb25   :  { %1160 = dma.done.wait [#allocation3], 32  }
 0xb26   :  { %1161 = vsyncadd [#allocation3], 4294967264 }
 0xb27   :  { %886 = vsyncpa [#allocation3], 1 }

</bundles_post_ra>
